<compile_context>
chip_gen: v7x
topology: tpu7x:2x2x1
jax: 0.10.0
libtpu: 0.0.40
codegen_flags: <defaults>
</compile_context>

<pallas_src>
import math

import jax
import jax.numpy as jnp
from jax import lax
from jax.experimental import pallas as pl
from jax.experimental.pallas import tpu as pltpu


def _rope_kernel(x_ref, cos_ref, sin_ref, o_ref):
    # x_ref:   (1, tr, L) input tile (interleaved lanes, possibly seq-folded)
    # cos_ref: (tr, L)    interleaved cos coefficients
    # sin_ref: (tr, L)    interleaved, sign-adjusted sin coefficients
    # o_ref:   (1, tr, L)
    x = x_ref[0].astype(jnp.float32)                     # (tr, L)
    L = x.shape[-1]
    # swap_pairs: swapped[:, j] = x[:, j ^ 1], built from two XLU lane
    # rotations + a parity select (VPU).  Circular wrap lanes are never
    # selected (j=0 is even, j=L-1 is odd), so the result is exact.
    lane = lax.broadcasted_iota(jnp.int32, x.shape, dimension=x.ndim - 1)
    fwd = pltpu.roll(x, shift=1, axis=x.ndim - 1)        # fwd[:, j] = x[:, j-1]
    bwd = pltpu.roll(x, shift=L - 1, axis=x.ndim - 1)    # bwd[:, j] = x[:, j+1]
    x_swapped = jnp.where((lane & 1) == 0, bwd, fwd)
    out = (x * cos_ref[...].astype(jnp.float32)
           + x_swapped * sin_ref[...].astype(jnp.float32))
    o_ref[0] = out.astype(o_ref.dtype)


def _pick_row_tile(rows, row_bytes, target_tile_bytes=4 << 20, max_rows=2048):
    """Largest row tile (multiple of 8, or full extent) within the byte target."""
    if rows <= 8:
        return rows
    tr = min(rows, max_rows, max(8, target_tile_bytes // max(row_bytes, 1)))
    if tr >= rows:
        return rows
    return max(8, (tr // 8) * 8)


# ---------------------------------------------------------------------------
# One-time coefficient prep (analogue of the PyTorch registered buffers).
# Keep these OUT of the per-call forward path.
# ---------------------------------------------------------------------------
def make_rope_buffers(max_seq_len, dim):
    # Matches the PyTorch __init__ exactly: (max_seq_len, dim // 2) tables.
    inv_freq = 1.0 / (10000.0 ** (jnp.arange(0, dim, 2, dtype=jnp.float32) / dim))
    t = jnp.arange(max_seq_len, dtype=jnp.float32)[:, None]
    freqs = t * inv_freq[None, :]
    return jnp.cos(freqs), jnp.sin(freqs)


def _interleave_coefficients(cos, sin):
    """(S, D//2) tables -> interleaved-lane (S, D) tables used by the kernel."""
    half = cos.shape[-1]
    cos_i = jnp.repeat(cos.astype(jnp.float32), 2, axis=-1)      # c0,c0,c1,c1,...
    sign = jnp.tile(jnp.array([-1.0, 1.0], jnp.float32), half)   # -,+,-,+,...
    sin_i = jnp.repeat(sin.astype(jnp.float32), 2, axis=-1) * sign[None, :]
    return cos_i, sin_i


def make_interleaved_rope_buffers(max_seq_len, dim, coef_dtype=jnp.float32):
    """Build-once buffers consumed by rotary_position_embedding()."""
    cos, sin = make_rope_buffers(max_seq_len, dim)
    cos_i, sin_i = _interleave_coefficients(cos, sin)
    return cos_i.astype(coef_dtype), sin_i.astype(coef_dtype)


# ---------------------------------------------------------------------------
# Forward.
# ---------------------------------------------------------------------------
def rotary_position_embedding(x, cos, sin):
    """Apply interleaved RoPE.

    x:        (B, S, D) with D even.
    cos, sin: preferably pre-interleaved (max_seq_len, D) buffers from
              make_interleaved_rope_buffers (built once, like the module's
              registered buffers).  Raw (max_seq_len, D // 2) tables are also
              accepted and expanded here (slow path; avoid in hot loops).
    Returns (B, S, D) in x.dtype.
    """
    B, S, D = x.shape
    assert D % 2 == 0, "rotary dim must be even"
    if cos.shape[-1] == D // 2:
        cos, sin = _interleave_coefficients(cos, sin)
    assert cos.shape[-1] == D and sin.shape[-1] == D
    assert S <= cos.shape[0]

    # Halve coefficient HBM traffic when activations are bf16; stay exact for f32.
    coef_dtype = jnp.bfloat16 if x.dtype == jnp.bfloat16 else jnp.float32
    cos = cos.astype(coef_dtype)
    sin = sin.astype(coef_dtype)

    # Fold k consecutive positions into the lane axis so the last dim is a
    # multiple of 128 (lane-dense vregs, unmasked stores).  Pure reshape.
    k = 128 // math.gcd(D, 128)
    s_pad = ((S + k - 1) // k) * k
    cos_s = cos[:S]
    sin_s = sin[:S]
    if s_pad != S:
        # TODO(synk): ragged tail (S % k != 0) costs one extra pad copy of x.
        x = jnp.pad(x, ((0, 0), (0, s_pad - S), (0, 0)))
        cos_s = jnp.pad(cos_s, ((0, s_pad - S), (0, 0)))
        sin_s = jnp.pad(sin_s, ((0, s_pad - S), (0, 0)))
    R = s_pad // k
    L = k * D
    x_f = x.reshape(B, R, L)
    cos_f = cos_s.reshape(R, L)
    sin_f = sin_s.reshape(R, L)

    x_item = jnp.dtype(x.dtype).itemsize
    coef_item = jnp.dtype(coef_dtype).itemsize
    tr = _pick_row_tile(R, L * max(x_item, coef_item))
    grid = (pl.cdiv(R, tr), B)

    # Double-buffered footprint: x in + out + cos + sin tiles.
    vmem_need = 2 * tr * L * 2 * (x_item + coef_item)
    vmem_limit = min(max(int(vmem_need * 1.5) + (8 << 20), 32 << 20), 56 << 20)

    out = pl.pallas_call(
        _rope_kernel,
        out_shape=jax.ShapeDtypeStruct((B, R, L), x.dtype),
        grid=grid,
        in_specs=[
            pl.BlockSpec((1, tr, L), lambda s, b: (b, s, 0)),   # x
            pl.BlockSpec((tr, L), lambda s, b: (s, 0)),         # cos (resident over b)
            pl.BlockSpec((tr, L), lambda s, b: (s, 0)),         # sin (resident over b)
        ],
        out_specs=pl.BlockSpec((1, tr, L), lambda s, b: (b, s, 0)),
        compiler_params=pltpu.CompilerParams(
            dimension_semantics=("parallel", "parallel"),
            vmem_limit_bytes=vmem_limit),
    )(x_f, cos_f, sin_f)

    out = out.reshape(B, s_pad, D)
    if s_pad != S:
        out = out[:, :S]
    return out


def reference_rope(x, cos, sin):
    # Pure-JAX mirror of the PyTorch forward (raw (max_seq_len, D//2) tables).
    S = x.shape[1]
    x1 = x[..., 0::2]
    x2 = x[..., 1::2]
    c = cos[:S][None, :, :]
    s = sin[:S][None, :, :]
    out1 = x1 * c - x2 * s
    out2 = x1 * s + x2 * c
    return jnp.stack([out1, out2], axis=-1).reshape(x.shape)


if __name__ == "__main__":
    # Small shapes consistent with the module: batch=2, seq=8, hidden=32.
    B, S, D = 2, 8, 32
    max_seq_len = 16

    key = jax.random.PRNGKey(0)
    x = jax.random.normal(key, (B, S, D), dtype=jnp.float32)

    cos_raw, sin_raw = make_rope_buffers(max_seq_len, D)           # module buffers
    cos_i, sin_i = make_interleaved_rope_buffers(max_seq_len, D)   # one-time prep

    out = rotary_position_embedding(x, cos_i, sin_i)
    out = jax.block_until_ready(out)

    ref = reference_rope(x, cos_raw, sin_raw)
    assert out.shape == (B, S, D), out.shape
    max_err = float(jnp.max(jnp.abs(out - ref)))
    assert jnp.allclose(out, ref, atol=1e-5, rtol=1e-5), max_err

    print("KERNEL_OK")
</pallas_src>

<mosaic_0001>
module attributes {stable_mosaic.version = 11 : i64} {
  func.func @_rope_kernel(%arg0: i32, %arg1: i32, %arg2: memref<1x2x128xf32, #tpu.memory_space<vmem>>, %arg3: memref<2x128xf32, #tpu.memory_space<vmem>>, %arg4: memref<2x128xf32, #tpu.memory_space<vmem>>, %arg5: memref<1x2x128xf32, #tpu.memory_space<vmem>>) attributes {dimension_semantics = [#tpu.dimension_semantics<parallel>, #tpu.dimension_semantics<parallel>], iteration_bounds = array<i64: 1, 2>, scalar_prefetch = 0 : i64, scratch_operands = 0 : i64, tpu.core_type = #tpu.core_type<tc>, window_params = [{transform_indices = @transform_0, window_bounds = array<i64: 1, 2, 128>}, {transform_indices = @transform_1, window_bounds = array<i64: 2, 128>}, {transform_indices = @transform_2, window_bounds = array<i64: 2, 128>}, {transform_indices = @transform_3, window_bounds = array<i64: 1, 2, 128>}]} {
    %c0 = arith.constant 0 : index
    %c0_0 = arith.constant 0 : index
    %c0_1 = arith.constant 0 : index
    %0 = vector.load %arg2[%c0, %c0_0, %c0_1] : memref<1x2x128xf32, #tpu.memory_space<vmem>>, vector<1x2x128xf32>
    %1 = vector.shape_cast %0 : vector<1x2x128xf32> to vector<2x128xf32>
    %2 = tpu.iota {dimensions = array<i32: 1>} : vector<2x128xi32>
    %c1_i32 = arith.constant 1 : i32
    %3 = tpu.dynamic_rotate %1 by %c1_i32 dim 1 : vector<2x128xf32>, i32 -> vector<2x128xf32>
    %c127_i32 = arith.constant 127 : i32
    %4 = tpu.dynamic_rotate %1 by %c127_i32 dim 1 : vector<2x128xf32>, i32 -> vector<2x128xf32>
    %c1_i32_2 = arith.constant 1 : i32
    %5 = vector.broadcast %c1_i32_2 : i32 to vector<2x128xi32>
    %6 = arith.andi %2, %5 : vector<2x128xi32>
    %c0_i32 = arith.constant 0 : i32
    %7 = vector.broadcast %c0_i32 : i32 to vector<2x128xi32>
    %8 = arith.cmpi eq, %6, %7 : vector<2x128xi32>
    %9 = arith.select %8, %4, %3 : vector<2x128xi1>, vector<2x128xf32>
    %c0_3 = arith.constant 0 : index
    %c0_4 = arith.constant 0 : index
    %10 = vector.load %arg3[%c0_3, %c0_4] : memref<2x128xf32, #tpu.memory_space<vmem>>, vector<2x128xf32>
    %11 = arith.mulf %1, %10 : vector<2x128xf32>
    %c0_5 = arith.constant 0 : index
    %c0_6 = arith.constant 0 : index
    %12 = vector.load %arg4[%c0_5, %c0_6] : memref<2x128xf32, #tpu.memory_space<vmem>>, vector<2x128xf32>
    %13 = arith.mulf %9, %12 : vector<2x128xf32>
    %14 = arith.addf %11, %13 : vector<2x128xf32>
    %c0_7 = arith.constant 0 : index
    %c0_8 = arith.constant 0 : index
    %c0_9 = arith.constant 0 : index
    %15 = vector.load %arg5[%c0_7, %c0_8, %c0_9] : memref<1x2x128xf32, #tpu.memory_space<vmem>>, vector<1x2x128xf32>
    %16 = vector.shape_cast %15 : vector<1x2x128xf32> to vector<2x128xf32>
    %17 = vector.shape_cast %14 : vector<2x128xf32> to vector<1x2x128xf32>
    tpu.vector_store %arg5[%c0_7, %c0_8, %c0_9], %17 {strides = array<i32>} : memref<1x2x128xf32, #tpu.memory_space<vmem>>, vector<1x2x128xf32>,
    return
  }
  func.func @transform_0(%arg0: i32, %arg1: i32) -> (i32, i32, i32) {
    %c0_i32 = arith.constant 0 : i32
    %c0_i32_0 = arith.constant 0 : i32
    return %arg1, %arg0, %c0_i32 : i32, i32, i32
  }
  func.func @transform_1(%arg0: i32, %arg1: i32) -> (i32, i32) {
    %c0_i32 = arith.constant 0 : i32
    %c0_i32_0 = arith.constant 0 : i32
    return %arg0, %c0_i32 : i32, i32
  }
  func.func @transform_2(%arg0: i32, %arg1: i32) -> (i32, i32) {
    %c0_i32 = arith.constant 0 : i32
    %c0_i32_0 = arith.constant 0 : i32
    return %arg0, %c0_i32 : i32, i32
  }
  func.func @transform_3(%arg0: i32, %arg1: i32) -> (i32, i32, i32) {
    %c0_i32 = arith.constant 0 : i32
    %c0_i32_0 = arith.constant 0 : i32
    return %arg1, %arg0, %c0_i32 : i32, i32, i32
  }
}

</mosaic_0001>

<bundles_post_ra>
// kernel: tpu_custom_call.1
= control target key start
LH: loop header
LB: loop body
LE: loop exit
PB: predicated region body
PF: predicated region fallthrough
CT: control target
= control target key end

     0   :  { %8 = vsyncpa [#allocation3], 0  ;;  %s773_s0 = inlined_call_operand.hbm [shape: f32[2,2,128], index: 0, kind: input, shape index: {}]   ;;  %s774_s1 = inlined_call_operand.vmem [shape: f32[2,128], index: 1, kind: input, shape index: {}]   ;;  %s775_s2 = inlined_call_operand.vmem [shape: f32[2,128], index: 2, kind: input, shape index: {}]   ;;  %s776_s3 = inlined_call_operand.hbm [shape: f32[2,2,128], index: 3, kind: output, shape index: {}]  }
   0x1   :  { %10 = vsyncpa [#allocation3 + $0x1], 0 }
   0x2   :  { %11 = vsyncpa [#allocation4], 0 }
   0x3   :  { %13 = vsyncpa [#allocation4 + $0x1], 0  ;;  %s595_s12 = smov 0   ;;  %s597_s13 = smov 0  }
   0x4   :  { %s599_s14 = smov 0   ;;  %s601_s15 = smov 0  }
   0x5   :  { %s603_s16 = smov 0   ;;  %s605_s17 = smov 0  }
   0x6 LB: > { %s378_s18 = sadd.s32 4294967295, %s569_s17   ;;  %s379_s19 = sadd.s32 4294967294, %s569_s17   ;;  %s569_s17 = sphi %s605_s17, %s19_s17   ;;  %s565_s16 = sphi %s603_s16, %s792_s16   ;;  %s561_s15 = sphi %s601_s15, %s791_s15   ;;  %s557_s14 = sphi %s599_s14, %s790_s14   ;;  %s553_s13 = sphi %s597_s13, %s789_s13   ;;  %s549_s12 = sphi %s595_s12, %s788_s12  }
   0x7   : > { %s28_s20 = sadd.s32 1, %s565_s16  ;;  %s40_s21 = sadd.s32 1, %s557_s14 }
   0x8   : > { %p29_p0 = scmp.ge.s32.totalorder %s28_s20, 2  ;;  %p47_p1 = scmp.ne.s32.totalorder %s557_s14, %s553_s13 }
   0x9   : > { %p48_p2 = scmp.eq.s32.totalorder %s569_s17, 0  ;;  %p53_p3 = scmp.ne.s32.totalorder %s553_s13, %s549_s12 }
   0xa   : > { %s794_s20 = smov (%p29_p0, %s28_s20), 0  ;;  %p54_p5 = scmp.eq.s32.totalorder %s378_s18, 0 }
   0xb   : > { %p636_p4 = por %p48_p2, %p47_p1  ;;  %s35_s23 = ssub.s32 %s565_s16, %s794_s20 }
   0xc   : > { %p131_p6 = scmp.eq.s32.totalorder %s378_s18, 1  ;;  %p38_p7 = scmp.eq.s32.totalorder %s35_s23, 0 }
   0xd   : > { %p642_p8 = por %p54_p5, %p53_p3  ;;  %p137_p10 = scmp.eq.s32.totalorder %s379_s19, 1 }
   0xe   : > { %p646_p9 = por %p131_p6, %p47_p1  ;;  %p405_p13 = scmp.lt.s32.totalorder %s569_s17, 2 }
   0xf   : > { %s651_s26 = scalar_select %p38_p7, %s557_s14, %s40_s21  }
  0x10   : > { %s780_s25 = scalar_select %p646_p9, 1, 0 }
  0x11   : > { %p653_p11 = por %p137_p10, %p53_p3  ;;  %s171_s28 = sand.u32 1, %s557_s14  }
  0x12   : > { %s384_s29 = sshll.u32 %s171_s28, 1  ;;  %s385_s30 = sshll.u32 %s565_s16, 5 }
  0x13   : > { %s781_s27 = scalar_select %p653_p11, 1, 0 }
  0x14   : > { %s664_s6 = scalar_lea.hbm %s773_s0, %s385_s30  ;;  %s175_s7 = scalar_lea.vmem [#allocation2], %s384_s29 }
  0x15   : > { %s183_s8 = sshll.u32 %s175_s7, 4  ;;  %p670_p0 = pnand %p405_p13, %p636_p4  ;;  %s666_s8 = int_to_ptr.vmem [resolvable:$true] %s183_s8 }
  0x16   : > { %s172_s10 = scalar_lea.sflag [#allocation3], %s171_s28  ;;  %s457_s11 = scalar_lea.hbm %s664_s6, 32 }
  0x17   : > { %p458_p3 = scmp.ne.s32.totalorder %s664_s6, %s457_s11  ;;  %p459_p5 = pneg %p670_p0 }
  0x18   : > { %s462_s21 = scalar_lea.hbm %s773_s0, 64  ;;  %p463_p4 = scmp.lt.u32.totalorder %s664_s6, %s773_s0 }
  0x19   : > { %p460_p6 = pnand %p459_p5, %p458_p3  ;;  %p464_p10 = scmp.lt.u32.totalorder %s462_s21, %s457_s11 }
  0x1a   : > { %p466_p12 = scmp.lt.u32.totalorder %s457_s11, %s664_s6 }
  0x1b   : > { %p461_p7 = pneg %p460_p6  ;;  %p465_p13 = por %p464_p10, %p463_p4 }
  0x1d   : > { %p467_p1 = por %p466_p12, %p465_p13 }
  0x1f   : > { %p468_p2 = pnand %p467_p1, %p461_p7 }
  0x21   : > { %471 = shalt.err (!%p468_p2)
}
  0x22   : > { %s472_s28 = scalar_lea.vmem %s666_s8, 32  ;;  %s571_s29 = smov [#allocation2]  }
  0x23   : > { %p473_p3 = scmp.ne.s32.totalorder %s666_s8, %s472_s28  ;;  %s477_s30 = sshll.u32 %s571_s29, 4  ;;  %s478_s30 = int_to_ptr.vmem [resolvable:$false] %s477_s30 }
  0x24   : > { %s479_s4 = scalar_lea.vmem %s478_s30, 64  ;;  %p480_p9 = scmp.lt.s32.totalorder %s666_s8, %s478_s30 }
  0x25   : > { %p475_p6 = pnand %p473_p3, %p459_p5  ;;  %p481_p4 = scmp.lt.s32.totalorder %s479_s4, %s472_s28 }
  0x27   : > { %p476_p11 = pneg %p475_p6  ;;  %p482_p10 = por %p481_p4, %p480_p9 }
  0x29   : > { %p483_p12 = pnand %p482_p10, %p476_p11 }
  0x2b   : > { %486 = shalt.err (!%p483_p12)
}
  0x2c   : > { %400 = dma.hbm_to_vmem [thread:$0]  (!%p670_p0), %s664_s6, 32, %s666_s8, %s172_s10  }
  0x2d   : > { %p783_p1 = scmp.lt.s32.totalorder %s569_s17, 3  ;;  %p784_p2 = scmp.ge.s32.totalorder %s569_s17, 1 }
  0x2f   : > { %p189_p5 = pnand %p784_p2, %p783_p1 }
  0x30   : > { %s706_s5 = sand.u32 (!%p189_p5), 1, %s553_s13  }
  0x31   : > { %192 = sbr.rel (%p189_p5) target bundleno = 196 (0xc4), region = 32  ;;  %s387_s7 = sshll.u32 (!%p189_p5), %s706_s5, 1 }
  0x32   : > { %s195_s11 = scalar_lea.sflag (!%p189_p5), [#allocation3], %s706_s5  ;;  %s198_s18 = scalar_lea.vmem (!%p189_p5), [#allocation2], %s387_s7 }
  0x38   : > { %540 = dma.done.wait (%p642_p8), %s195_s11, 32  }
  0x39   : > { %542 = vsyncadd (%p642_p8), %s195_s11, 4294967264  ;;  %v237_v0 = vld [vmem:[%s198_s18] sm:$0x3]  ;;  %s572_s6 = smov 1   ;;  %s573_s8 = smov 127   ;;  %v238_v1 = vlaneseq }
  0x3a   : > { %240 = vrot.lane.b32.xlu0 %v237_v0, %s572_s6  ;;  %v247_v5 = vld [vmem:[%s774_s1] sm:$0x3]  ;;  %s390_s24 = sshll.u32 %s561_s15, 5  ;;  %s228_s22 = scalar_lea.vmem [#allocation5], %s387_s7 }
  0x3b   : > { %v239_v2 = vand.u32 127, %v238_v1  ;;  %v249_v6 = vld [vmem:[%s775_s2] sm:$0x3]  ;;  %v248_v7 = vmul.f32 %v247_v5, %v237_v0  ;;  %s268_s23 = sshll.u32 %s228_s22, 4  ;;  %s724_s30 = scalar_lea.hbm %s776_s3, %s390_s24  ;;  %s726_s23 = int_to_ptr.vmem [resolvable:$true] %s268_s23 }
  0x3c   : > { %s254_s4 = scalar_lea.sflag [#allocation4], %s706_s5  ;;  %s487_s11 = scalar_lea.vmem %s726_s23, 32 }
  0x3d   : > { %v244_v3 = vand.u32 1, %v239_v2  ;;  %p488_p8 = scmp.ne.s32.totalorder %s726_s23, %s487_s11  ;;  %p785_p9 = scmp.ne.s32.totalorder %s780_s25, 0 }
  0x3e   : > { %242 = vrot.lane.b32.xlu0 %v237_v0, %s573_s8  ;;  %s574_s15 = smov [#allocation5]  }
  0x3f   : > { %vm245_vm0 = vcmp.eq.s32.totalorder %v244_v3, 0  ;;  %p489_p11 = pnand %p488_p8, %p785_p9  ;;  %s491_s7 = sshll.u32 %s574_s15, 4  ;;  %s492_s7 = int_to_ptr.vmem [resolvable:$false] %s491_s7 }
  0x40   : > { %s493_s18 = scalar_lea.vmem %s492_s7, 64  ;;  %p494_p7 = scmp.lt.s32.totalorder %s726_s23, %s492_s7 }
  0x41   : > { %p490_p0 = pneg %p489_p11  ;;  %p495_p13 = scmp.lt.s32.totalorder %s493_s18, %s487_s11 }
  0x43   : > { %p496_p3 = por %p495_p13, %p494_p7 }
  0x45   : > { %p497_p6 = pnand %p496_p3, %p490_p0 }
  0xac   : > { %v241_v4 = vpop.permute.xlu0 %240 }
  0xb0   : > { %v243_v8 = vpop.permute.xlu0 %242 }
  0xb1   : > { %v246_v9 = vsel %vm245_vm0, %v243_v8, %v241_v4 }
  0xb2   : > { %v250_v10 = vmul.f32 %v249_v6, %v246_v9 }
  0xb4   : > { %v251_v11 = vadd.f32 %v250_v10, %v248_v7 }
  0xb6   : > { %252 = vst [vmem:[%s228_s22] sm:$0x3] %v251_v11 }
  0xb7   : > { %500 = shalt.err (!%p497_p6)
}
  0xb8   : > { %s501_s5 = scalar_lea.hbm %s724_s30, 32  ;;  %s505_s9 = scalar_lea.hbm %s776_s3, 64 }
  0xb9   : > { %p502_p4 = scmp.ne.s32.totalorder %s724_s30, %s501_s5  ;;  %p506_p1 = scmp.lt.u32.totalorder %s724_s30, %s776_s3 }
  0xba   : > { %p507_p2 = scmp.lt.u32.totalorder %s505_s9, %s501_s5  ;;  %p509_p8 = scmp.lt.u32.totalorder %s501_s5, %s724_s30 }
  0xbb   : > { %p503_p10 = pnand %p502_p4, %p785_p9 }
  0xbc   : > { %p508_p5 = por %p507_p2, %p506_p1 }
  0xbd   : > { %p504_p12 = pneg %p503_p10 }
  0xbe   : > { %p510_p11 = por %p509_p8, %p508_p5 }
  0xc0   : > { %p511_p0 = pnand %p510_p11, %p504_p12 }
  0xc2   : > { %514 = shalt.err (!%p511_p0)
}
  0xc3   : > { %395 = dma.vmem_to_hbm [thread:$0]  (%p785_p9), %s726_s23, 32, %s724_s30, %s254_s4  }
  0xc4 PF: > { %s280_s21 = sand.u32 1, %s549_s12   ;;  %p786_p7 = scmp.ne.s32.totalorder %s781_s27, 0 }
  0xc5   : > { %p787_p13 = scmp.ge.s32.totalorder %s569_s17, 2  ;;  %s281_s24 = scalar_lea.sflag [#allocation4], %s280_s21 }
  0xc7   : > { %p402_p3 = pnand %p787_p13, %p786_p7 }
  0xc9   : > { %544 = dma.done.wait (!%p402_p3), %s281_s24, 32  }
  0xca   : > { %546 = vsyncadd (!%p402_p3), %s281_s24, 4294967264  ;;  %s19_s17 = sadd.s32 1, %s569_s17   ;;  %s788_s12 = smov %s553_s13 }
  0xcb   : > { %p16_p6 = scmp.ge.s32.totalorder %s19_s17, 4   ;;  %s789_s13 = smov %s557_s14 }
  0xcc   : > { %s790_s14 = smov %s651_s26  ;;  %s791_s15 = smov %s565_s16 }
  0xcd   : > { %s792_s16 = smov %s794_s20  ;;  %18 = sbr.rel (!%p16_p6) target bundleno = 6 (0x6), region = 83 }
  0xd4   :  { %286 = vsyncpa [#allocation3], 1 }
  0xd5   :  { %288 = vsyncpa [#allocation3 + $0x1], 1 }
  0xd6   :  { %289 = vsyncpa [#allocation4], 1 }
  0xd7   :  { %291 = vsyncpa [#allocation4 + $0x1], 1 }

</bundles_post_ra>
